<compile_context>
chip_gen: v5e
topology: v5e:2x2
jax: 0.10.0
libtpu: 0.0.40
codegen_flags: <defaults>
</compile_context>

<pallas_src>
import functools

import numpy as np
import jax
import jax.numpy as jnp
from jax import lax
from jax.experimental import pallas as pl
from jax.experimental.pallas import tpu as pltpu


def _slope_kernel(bias_ref, x_ref, dx_ref, dy_ref, *, W):
    """Sobel dx/dy over `bn` flattened images (row-major, length L = H*W).

    Neighbour access uses pltpu.roll (XLU lane rotations) on the flat vector;
    wrap-around contributions are zeroed by 0/1 masks built from a (1, L) iota
    and broadcast along the batch-block (sublane) dim.  The 3x3 filters are
    applied in separable form: one shared horizontal pass, then a cheap
    vertical pass (+-W lane shift == +-1 row).
    """
    _, L = x_ref.shape
    b = bias_ref[0]
    xv = x_ref[...]
    f32 = xv.dtype

    # Boundary masks, computed only at (1, L); broadcast when applied.
    i = lax.broadcasted_iota(jnp.int32, (1, L), 1)
    j = i % W
    keep_l = (j > 0).astype(f32)        # left neighbour inside the image
    keep_r = (j < W - 1).astype(f32)    # right neighbour inside the image
    keep_u = (i >= W).astype(f32)       # row above inside the image
    keep_d = (i < L - W).astype(f32)    # row below inside the image

    # Horizontal pass (shared by both filters).  roll(x, s)[i] == x[(i-s) % L];
    # the circular wrap-around values are exactly the masked-out positions.
    left = pltpu.roll(xv, shift=1, axis=1) * keep_l        # x[r, j-1] (0 at j==0)
    right = pltpu.roll(xv, shift=L - 1, axis=1) * keep_r   # x[r, j+1] (0 at j==W-1)
    hdiff = right - left                                   # [-1, 0, 1]
    hsum = left + 2.0 * xv + right                         # [ 1, 2, 1]

    # Vertical pass: +-W lane rotation is a +-1 row shift in the flat layout.
    up_d = pltpu.roll(hdiff, shift=W, axis=1) * keep_u      # hdiff[r-1, j]
    dn_d = pltpu.roll(hdiff, shift=L - W, axis=1) * keep_d  # hdiff[r+1, j]
    up_s = pltpu.roll(hsum, shift=W, axis=1) * keep_u       # hsum [r-1, j]
    dn_s = pltpu.roll(hsum, shift=L - W, axis=1) * keep_d   # hsum [r+1, j]

    dx_ref[...] = up_d + 2.0 * hdiff + dn_d + b
    dy_ref[...] = dn_s - up_s + b


def _pick_bn(N, L, itemsize, block_bytes):
    """Largest sublane-legal batch-block (whole images) fitting the budget."""
    max_elems = max(block_bytes // itemsize, L)
    valid = [d for d in range(1, N + 1)
             if N % d == 0 and (d == N or d % 8 == 0) and d * L <= max_elems]
    if not valid:
        # Even a single image exceeds the budget.
        # TODO(synk): row-block tiling with a 2-row halo for very large H*W.
        return N
    # Prefer >= 2 grid steps so a 2-TensorCore chip (v7x) can shard the grid.
    multi = [d for d in valid if N // d >= 2]
    return max(multi) if multi else max(valid)


def slope_map(x, bias, *, block_bytes=None):
    """x: (N, 1, H, W) float32, bias: (1,) float32 -> (dx, dy) each (N, 1, H, W)."""
    N, C, H, W = x.shape
    assert C == 1, "Slope_map conv weights are (1,1,3,3): input must have 1 channel"
    L = H * W

    # Flatten each image (free, row-major) so loads/stores are lane-dense.
    # TODO(synk): if L is not a multiple of 128, output stores are masked; a
    # fully lane-dense re-blocking over N*L would remove that for odd shapes.
    xf = x.reshape(N, L)

    # Derive the VMEM budget from the actual device (64 MiB v7x, 128 MiB v5e/v6e).
    try:
        vmem_cap = int(pltpu.get_tpu_info().vmem_capacity_bytes)
    except Exception:
        vmem_cap = 64 * 1024 * 1024  # conservative (v7x per-core VMEM)
    vmem_budget = (vmem_cap * 3) // 5          # headroom for compiler scratch
    if block_bytes is None:
        # Resident footprint ~= 6x block (input x2 double-buffered + 2 outputs x2).
        block_bytes = max(L * x.dtype.itemsize,
                          min(8 * 1024 * 1024, vmem_budget // 8))

    bn = _pick_bn(N, L, x.dtype.itemsize, block_bytes)

    kernel = functools.partial(_slope_kernel, W=W)

    dxf, dyf = pl.pallas_call(
        kernel,
        out_shape=(
            jax.ShapeDtypeStruct((N, L), x.dtype),
            jax.ShapeDtypeStruct((N, L), x.dtype),
        ),
        grid=(N // bn,),
        in_specs=[
            pl.BlockSpec(memory_space=pltpu.MemorySpace.SMEM),   # bias scalar
            pl.BlockSpec((bn, L), lambda n: (n, 0)),             # flat images
        ],
        out_specs=(
            pl.BlockSpec((bn, L), lambda n: (n, 0)),
            pl.BlockSpec((bn, L), lambda n: (n, 0)),
        ),
        compiler_params=pltpu.CompilerParams(
            dimension_semantics=("parallel",),
            vmem_limit_bytes=int(vmem_budget),
        ),
    )(bias, xf)

    # Free reshapes back to NCHW.
    return dxf.reshape(N, 1, H, W), dyf.reshape(N, 1, H, W)


def _reference(x, bias):
    """Pure-JAX reference using lax.conv (mirrors torch.conv2d semantics)."""
    w1 = jnp.array([[-1., 0., 1.],
                    [-2., 0., 2.],
                    [-1., 0., 1.]], dtype=jnp.float32).reshape(1, 1, 3, 3)
    w2 = jnp.array([[-1., -2., -1.],
                    [0., 0., 0.],
                    [1., 2., 1.]], dtype=jnp.float32).reshape(1, 1, 3, 3)
    dn = ("NCHW", "OIHW", "NCHW")
    dx = jax.lax.conv_general_dilated(x, w1, (1, 1), ((1, 1), (1, 1)),
                                      dimension_numbers=dn) + bias[0]
    dy = jax.lax.conv_general_dilated(x, w2, (1, 1), ((1, 1), (1, 1)),
                                      dimension_numbers=dn) + bias[0]
    return dx, dy


if __name__ == "__main__":
    key = jax.random.PRNGKey(0)
    N, C, H, W = 2, 1, 16, 16
    x = jax.random.normal(key, (N, C, H, W), dtype=jnp.float32)
    # Parameters, deterministically initialized as in the module (weights are
    # hard-coded Sobel filters inside the kernel; bias is zeros(1)).
    bias = jnp.zeros((1,), dtype=jnp.float32)

    dx, dy = slope_map(x, bias)
    jax.block_until_ready((dx, dy))

    dx_ref, dy_ref = _reference(x, bias)
    np.testing.assert_allclose(np.asarray(dx), np.asarray(dx_ref), rtol=1e-5, atol=1e-5)
    np.testing.assert_allclose(np.asarray(dy), np.asarray(dy_ref), rtol=1e-5, atol=1e-5)

    print("KERNEL_OK")
</pallas_src>

<mosaic_0001>
module attributes {stable_mosaic.version = 11 : i64} {
  func.func @_slope_kernel(%arg0: i32, %arg1: memref<1xf32, #tpu.memory_space<smem>>, %arg2: memref<2x256xf32, #tpu.memory_space<vmem>>, %arg3: memref<2x256xf32, #tpu.memory_space<vmem>>, %arg4: memref<2x256xf32, #tpu.memory_space<vmem>>) attributes {dimension_semantics = [#tpu.dimension_semantics<parallel>], iteration_bounds = array<i64: 1>, scalar_prefetch = 0 : i64, scratch_operands = 0 : i64, tpu.core_type = #tpu.core_type<tc>, window_params = [{transform_indices = @transform_0, window_bounds = array<i64: 1>}, {transform_indices = @transform_1, window_bounds = array<i64: 2, 256>}, {transform_indices = @transform_2, window_bounds = array<i64: 2, 256>}, {transform_indices = @transform_3, window_bounds = array<i64: 2, 256>}]} {
    %c0 = arith.constant 0 : index
    %0 = memref.load %arg1[%c0] : memref<1xf32, #tpu.memory_space<smem>>
    %c0_0 = arith.constant 0 : index
    %c0_1 = arith.constant 0 : index
    %1 = vector.load %arg2[%c0_0, %c0_1] : memref<2x256xf32, #tpu.memory_space<vmem>>, vector<2x256xf32>
    %2 = tpu.iota {dimensions = array<i32: 1>} : vector<1x256xi32>
    %c16_i32 = arith.constant 16 : i32
    %c0_i32 = arith.constant 0 : i32
    %3 = arith.cmpi eq, %c16_i32, %c0_i32 : i32
    %c1_i32 = arith.constant 1 : i32
    %4 = arith.select %3, %c1_i32, %c16_i32 : i32
    %5 = vector.broadcast %4 : i32 to vector<1x256xi32>
    %6 = arith.remsi %2, %5 : vector<1x256xi32>
    %c0_i32_2 = arith.constant 0 : i32
    %7 = vector.broadcast %c0_i32_2 : i32 to vector<1x256xi32>
    %8 = arith.cmpi ne, %6, %7 : vector<1x256xi32>
    %c0_i32_3 = arith.constant 0 : i32
    %9 = vector.broadcast %c0_i32_3 : i32 to vector<1x256xi32>
    %10 = arith.cmpi slt, %6, %9 : vector<1x256xi32>
    %c0_i32_4 = arith.constant 0 : i32
    %11 = arith.cmpi slt, %4, %c0_i32_4 : i32
    %12 = vector.broadcast %11 : i1 to vector<1x256xi1>
    %13 = vector.broadcast %12 : vector<1x256xi1> to vector<1x256xi1>
    %14 = arith.xori %10, %13 : vector<1x256xi1>
    %15 = arith.andi %14, %8 : vector<1x256xi1>
    %16 = vector.broadcast %4 : i32 to vector<1x256xi32>
    %17 = arith.addi %6, %16 : vector<1x256xi32>
    %18 = arith.select %15, %17, %6 : vector<1x256xi1>, vector<1x256xi32>
    %c0_i32_5 = arith.constant 0 : i32
    %19 = vector.broadcast %c0_i32_5 : i32 to vector<1x256xi32>
    %20 = arith.cmpi sgt, %18, %19 : vector<1x256xi32>
    %21 = arith.extui %20 : vector<1x256xi1> to vector<1x256xi32>
    %22 = arith.sitofp %21 : vector<1x256xi32> to vector<1x256xf32>
    %c15_i32 = arith.constant 15 : i32
    %23 = vector.broadcast %c15_i32 : i32 to vector<1x256xi32>
    %24 = arith.cmpi slt, %18, %23 : vector<1x256xi32>
    %25 = arith.extui %24 : vector<1x256xi1> to vector<1x256xi32>
    %26 = arith.sitofp %25 : vector<1x256xi32> to vector<1x256xf32>
    %c16_i32_6 = arith.constant 16 : i32
    %27 = vector.broadcast %c16_i32_6 : i32 to vector<1x256xi32>
    %28 = arith.cmpi sge, %2, %27 : vector<1x256xi32>
    %29 = arith.extui %28 : vector<1x256xi1> to vector<1x256xi32>
    %30 = arith.sitofp %29 : vector<1x256xi32> to vector<1x256xf32>
    %c240_i32 = arith.constant 240 : i32
    %31 = vector.broadcast %c240_i32 : i32 to vector<1x256xi32>
    %32 = arith.cmpi slt, %2, %31 : vector<1x256xi32>
    %33 = arith.extui %32 : vector<1x256xi1> to vector<1x256xi32>
    %34 = arith.sitofp %33 : vector<1x256xi32> to vector<1x256xf32>
    %c1_i32_7 = arith.constant 1 : i32
    %35 = tpu.dynamic_rotate %1 by %c1_i32_7 dim 1 : vector<2x256xf32>, i32 -> vector<2x256xf32>
    %36 = vector.broadcast %22 : vector<1x256xf32> to vector<2x256xf32>
    %37 = arith.mulf %35, %36 : vector<2x256xf32>
    %c255_i32 = arith.constant 255 : i32
    %38 = tpu.dynamic_rotate %1 by %c255_i32 dim 1 : vector<2x256xf32>, i32 -> vector<2x256xf32>
    %39 = vector.broadcast %26 : vector<1x256xf32> to vector<2x256xf32>
    %40 = arith.mulf %38, %39 : vector<2x256xf32>
    %41 = arith.subf %40, %37 : vector<2x256xf32>
    %cst = arith.constant 2.000000e+00 : f32
    %42 = vector.broadcast %cst : f32 to vector<2x256xf32>
    %43 = arith.mulf %42, %1 : vector<2x256xf32>
    %44 = arith.addf %37, %43 : vector<2x256xf32>
    %45 = arith.addf %44, %40 : vector<2x256xf32>
    %c16_i32_8 = arith.constant 16 : i32
    %46 = tpu.dynamic_rotate %41 by %c16_i32_8 dim 1 : vector<2x256xf32>, i32 -> vector<2x256xf32>
    %47 = vector.broadcast %30 : vector<1x256xf32> to vector<2x256xf32>
    %48 = arith.mulf %46, %47 : vector<2x256xf32>
    %c240_i32_9 = arith.constant 240 : i32
    %49 = tpu.dynamic_rotate %41 by %c240_i32_9 dim 1 : vector<2x256xf32>, i32 -> vector<2x256xf32>
    %50 = vector.broadcast %34 : vector<1x256xf32> to vector<2x256xf32>
    %51 = arith.mulf %49, %50 : vector<2x256xf32>
    %c16_i32_10 = arith.constant 16 : i32
    %52 = tpu.dynamic_rotate %45 by %c16_i32_10 dim 1 : vector<2x256xf32>, i32 -> vector<2x256xf32>
    %53 = vector.broadcast %30 : vector<1x256xf32> to vector<2x256xf32>
    %54 = arith.mulf %52, %53 : vector<2x256xf32>
    %c240_i32_11 = arith.constant 240 : i32
    %55 = tpu.dynamic_rotate %45 by %c240_i32_11 dim 1 : vector<2x256xf32>, i32 -> vector<2x256xf32>
    %56 = vector.broadcast %34 : vector<1x256xf32> to vector<2x256xf32>
    %57 = arith.mulf %55, %56 : vector<2x256xf32>
    %cst_12 = arith.constant 2.000000e+00 : f32
    %58 = vector.broadcast %cst_12 : f32 to vector<2x256xf32>
    %59 = arith.mulf %58, %41 : vector<2x256xf32>
    %60 = arith.addf %48, %59 : vector<2x256xf32>
    %61 = arith.addf %60, %51 : vector<2x256xf32>
    %62 = vector.broadcast %0 : f32 to vector<2x256xf32>
    %63 = arith.addf %61, %62 : vector<2x256xf32>
    %c0_13 = arith.constant 0 : index
    %c0_14 = arith.constant 0 : index
    %64 = vector.load %arg3[%c0_13, %c0_14] : memref<2x256xf32, #tpu.memory_space<vmem>>, vector<2x256xf32>
    tpu.vector_store %arg3[%c0_13, %c0_14], %63 {strides = array<i32>} : memref<2x256xf32, #tpu.memory_space<vmem>>, vector<2x256xf32>,
    %65 = arith.subf %57, %54 : vector<2x256xf32>
    %66 = vector.broadcast %0 : f32 to vector<2x256xf32>
    %67 = arith.addf %65, %66 : vector<2x256xf32>
    %c0_15 = arith.constant 0 : index
    %c0_16 = arith.constant 0 : index
    %68 = vector.load %arg4[%c0_15, %c0_16] : memref<2x256xf32, #tpu.memory_space<vmem>>, vector<2x256xf32>
    tpu.vector_store %arg4[%c0_15, %c0_16], %67 {strides = array<i32>} : memref<2x256xf32, #tpu.memory_space<vmem>>, vector<2x256xf32>,
    return
  }
  func.func @transform_0(%arg0: i32) -> i32 {
    %c0_i32 = arith.constant 0 : i32
    %c0_i32_0 = arith.constant 0 : i32
    return %c0_i32 : i32
  }
  func.func @transform_1(%arg0: i32) -> (i32, i32) {
    %c0_i32 = arith.constant 0 : i32
    %c0_i32_0 = arith.constant 0 : i32
    return %arg0, %c0_i32 : i32, i32
  }
  func.func @transform_2(%arg0: i32) -> (i32, i32) {
    %c0_i32 = arith.constant 0 : i32
    %c0_i32_0 = arith.constant 0 : i32
    return %arg0, %c0_i32 : i32, i32
  }
  func.func @transform_3(%arg0: i32) -> (i32, i32) {
    %c0_i32 = arith.constant 0 : i32
    %c0_i32_0 = arith.constant 0 : i32
    return %arg0, %c0_i32 : i32, i32
  }
}

</mosaic_0001>

<bundles_post_ra>
// kernel: tpu_custom_call.1
= control target key start
LH: loop header
LB: loop body
LE: loop exit
PB: predicated region body
PF: predicated region fallthrough
CT: control target
= control target key end

     0   :  { %10 = vsyncpa [#allocation4], 0  ;;  %s377_s0 = inlined_call_operand.<no memory space> [shape: f32[1], index: 0, kind: input, shape index: {}]   ;;  %s378_s1 = inlined_call_operand.hbm [shape: f32[2,256], index: 1, kind: input, shape index: {}]   ;;  %s379_s2 = inlined_call_operand.hbm [shape: f32[2,256], index: 2, kind: output, shape index: {0}]   ;;  %s380_s3 = inlined_call_operand.hbm [shape: f32[2,256], index: 3, kind: output, shape index: {1}]  }
   0x1   :  { %11 = vsyncpa [#allocation5], 0 }
   0x2   :  { %12 = vsyncpa [#allocation8], 0  ;;  %s20_s14 = sshll.u32 %s378_s1, 4  ;;  %s310_s15 = smov [#allocation3]   ;;  %s21_s14 = int_to_ptr.hbm [resolvable:$true] %s20_s14 }
   0x3   :  { %s22_s16 = sshll.u32 %s310_s15, 4  ;;  %s23_s16 = int_to_ptr.vmem [resolvable:$true] %s22_s16 }
   0x4   :  { %25 = dma.hbm_to_vmem [thread:$0]  %s21_s14, 64, %s23_s16, [#allocation4]  }
   0x5   :  { %304 = dma.done.wait [#allocation4], 64  }
   0x6   :  { %305 = vsyncadd [#allocation4], 4294967232  ;;  %v31_v0 = vld [vmem:[#allocation3] sm:$0xf]  ;;  %s311_s17 = smov 1   ;;  %s312_s18 = smov 127   ;;  %v32_v6 = vlaneseq  ;;  %v165_v55 = vstv %s377_s0 }
   0x7   :  { %84 = vst [vmem:[#allocation1] ss:$4 sm:$0xff] %v31_v0  ;;  %v114_v3 = vmul.f32 2.0, %v31_v0  ;;  %v313_v14 = vmov 0.0   ;;  %s314_s1 = smov 112   ;;  %s315_s19 = smov 16  }
   0x8   :  { %v341_v7 = vand.u32 127, %v32_v6  ;;  %s316_s22 = smov [#allocation6]   ;;  %s192_s26 = sshll.u32 %s379_s2, 4  ;;  %vm171_vm10 = vcmask 1041408   ;;  %s193_s26 = int_to_ptr.hbm [resolvable:$true] %s192_s26 }
   0x9   :  { %s190_s23 = sshll.u32 %s316_s22, 4  ;;  %s317_s0 = smov [#allocation7]   ;;  %s191_s23 = int_to_ptr.vmem [resolvable:$true] %s190_s23 }
   0xa   :  { %v34_v9 = vadd.s32 128, %v341_v7  ;;  %v39_v10 = vand.u32 15, %v341_v7  ;;  %vm93_vm2 = vcmp.lt.s32.totalorder %v341_v7, 1  ;;  %vm107_vm5 = vcmp.lt.s32.totalorder %v341_v7, 127  ;;  %s201_s2 = sshll.u32 %s317_s0, 4  ;;  %s203_s29 = sshll.u32 %s380_s3, 4  ;;  %s202_s2 = int_to_ptr.vmem [resolvable:$true] %s201_s2  ;;  %s204_s29 = int_to_ptr.hbm [resolvable:$true] %s203_s29 }
   0xb   :  { %vm71_vm6 = vcmp.ge.s32.totalorder %v341_v7, 16  ;;  %vm129_vm7 = vcmp.lt.s32.totalorder %v341_v7, 16  ;;  %vm138_vm9 = vcmp.lt.s32.totalorder %v341_v7, 112 }
   0xc   :  { %v46_v11 = vand.u32 15, %v34_v9  ;;  %vm59_vm0 = vcmp.gt.s32.totalorder %v39_v10, 0  ;;  %vm65_vm3 = vcmp.lt.s32.totalorder %v39_v10, 15  ;;  %v222_v38 = vsel %vm71_vm6, 1.0, %v313_v14 }
   0xd   :  { %v218_v15 = vsel %vm59_vm0, 1.0, %v313_v14  ;;  %v220_v19 = vsel %vm65_vm3, 1.0, %v313_v14  ;;  %vm78_vm8 = vcmp.lt.s32.totalorder %v34_v9, 240 }
   0xe   :  { %v85_v1 = vld.sshfl [vmem:[#allocation1] sm:$0xff pattern:$0x73625140]  ;;  %v86_v2 = vld.sshfl [vmem:[#allocation1 + $0x8] sm:$0xff pattern:$0x73625140] }
   0xf   :  { %89 = vrot.lane.b32.xlu0 %v85_v1, %s311_s17  ;;  %98 = vst [vmem:[#allocation1] ss:$4 sm:$0xff] %v31_v0  ;;  %vm60_vm1 = vcmp.gt.s32.totalorder %v46_v11, 0  ;;  %vm66_vm4 = vcmp.lt.s32.totalorder %v46_v11, 15  ;;  %v223_v43 = vsel %vm78_vm8, 1.0, %v313_v14 }
  0x10   :  { %v219_v16 = vsel %vm60_vm1, 1.0, %v313_v14  ;;  %v221_v20 = vsel %vm66_vm4, 1.0, %v313_v14 }
  0x16   :  { %v99_v4 = vld.sshfl [vmem:[#allocation1] sm:$0xff pattern:$0x73625140]  ;;  %v100_v5 = vld.sshfl [vmem:[#allocation1 + $0x8] sm:$0xff pattern:$0x73625140] }
  0x17   :  { %91 = vrot.lane.b32.xlu0 %v86_v2, %s311_s17  ;;  %103 = vrot.lane.b32.xlu1 %v99_v4, %s312_s18  ;;  %116 = vst [vmem:[#allocation1] ss:$4 sm:$0xff] %v114_v3 }
  0x1e   :  { %v117_v30 = vld.sshfl [vmem:[#allocation1] sm:$0xff pattern:$0x73625140]  ;;  %v118_v31 = vld.sshfl [vmem:[#allocation1 + $0x8] sm:$0xff pattern:$0x73625140] }
  0x1f   :  { %105 = vrot.lane.b32.xlu1 %v100_v5, %s312_s18 }
  0x81   :  { %v90_v8 = vpop.permute.xlu0 %89 }
  0x89   :  { %v104_v12 = vpop.permute.xlu1 %103  ;;  %v92_v13 = vpop.permute.xlu0 %91 }
  0x8a   :  { %v94_v17 = vsel %vm93_vm2, %v90_v8, %v92_v13  ;;  %v95_v18 = vsel %vm93_vm2, %v92_v13, %v90_v8 }
  0x8b   :  { %v96_v24 = vmul.f32 %v218_v15, %v95_v18  ;;  %v97_v25 = vmul.f32 %v219_v16, %v94_v17 }
  0x8d   :  { %v121_v32 = vadd.f32 %v117_v30, %v96_v24  ;;  %v122_v33 = vadd.f32 %v118_v31, %v97_v25 }
  0x91   :  { %v106_v21 = vpop.permute.xlu1 %105 }
  0x92   :  { %v108_v22 = vsel %vm107_vm5, %v104_v12, %v106_v21  ;;  %v109_v23 = vsel %vm107_vm5, %v106_v21, %v104_v12 }
  0x93   :  { %v110_v26 = vmul.f32 %v220_v19, %v108_v22  ;;  %v111_v27 = vmul.f32 %v221_v20, %v109_v23 }
  0x95   :  { %v113_v28 = vsub.f32 %v111_v27, %v97_v25  ;;  %v112_v29 = vsub.f32 %v110_v26, %v96_v24  ;;  %v124_v34 = vadd.f32 %v122_v33, %v111_v27  ;;  %v123_v35 = vadd.f32 %v121_v32, %v110_v26 }
  0x97   :  { %136 = vrot.lane.b32.xlu1 %v113_v28, %s314_s1  ;;  %134 = vrot.lane.b32.xlu0 %v112_v29, %s314_s1  ;;  %v160_v44 = vmul.f32 2.0, %v113_v28  ;;  %v159_v47 = vmul.f32 2.0, %v112_v29 }
  0x98   :  { %125 = vrot.lane.b32.xlu2 %v112_v29, %s315_s19 }
  0x9f   :  { %153 = vrot.lane.b32.xlu0 %v124_v34, %s314_s1  ;;  %143 = vrot.lane.b32.xlu1 %v123_v35, %s315_s19 }
  0xa0   :  { %127 = vrot.lane.b32.xlu2 %v113_v28, %s315_s19 }
  0xa8   :  { %151 = vrot.lane.b32.xlu2 %v123_v35, %s314_s1 }
  0xb0   :  { %145 = vrot.lane.b32.xlu2 %v124_v34, %s315_s19 }
  0xf2   :  { %v126_v36 = vpop.permute.xlu2 %125 }
  0xfa   :  { %v128_v37 = vpop.permute.xlu2 %127 }
  0xfb   :  { %v131_v39 = vsel %vm129_vm7, %v128_v37, %v126_v36  ;;  %v130_v42 = vsel %vm129_vm7, %v126_v36, %v128_v37 }
  0xfc   :  { %v132_v41 = vmul.f32 %v222_v38, %v131_v39  ;;  %v162_v50 = vadd.f32 %v160_v44, %v130_v42 }
  0xfe   :  { %v161_v52 = vadd.f32 %v159_v47, %v132_v41 }
 0x102   :  { %v152_v40 = vpop.permute.xlu2 %151 }
 0x109   :  { %v137_v45 = vpop.permute.xlu1 %136  ;;  %v135_v46 = vpop.permute.xlu0 %134 }
 0x10a   :  { %v139_v48 = vsel %vm138_vm9, %v135_v46, %v137_v45  ;;  %v140_v49 = vsel %vm138_vm9, %v137_v45, %v135_v46  ;;  %v146_v57 = vpop.permute.xlu2 %145 }
 0x10b   :  { %v142_v51 = vmul.f32 %v223_v43, %v140_v49  ;;  %v163_v53 = vadd.f32 %v161_v52, %v139_v48 }
 0x10d   :  { %v164_v54 = vadd.f32 %v162_v50, %v142_v51  ;;  %v166_v58 = vadd.f32 %v165_v55, %v163_v53 }
 0x10f   :  { %v167_v56 = vadd.f32 %v165_v55, %v164_v54 }
 0x111   :  { %v170_v59 = vrot.slane %v167_v56, 6  ;;  %v154_v60 = vpop.permute.xlu0 %153  ;;  %v144_v61 = vpop.permute.xlu1 %143 }
 0x112   :  { %v156_v62 = vsel %vm138_vm9, %v154_v60, %v152_v40  ;;  %v148_v63 = vsel %vm129_vm7, %v146_v57, %v144_v61  ;;  %v155_v3 = vsel %vm138_vm9, %v152_v40, %v154_v60  ;;  %v147_v4 = vsel %vm129_vm7, %v144_v61, %v146_v57 }
 0x113   :  { %v158_v0 = vmul.f32 %v223_v43, %v156_v62  ;;  %v149_v1 = vmul.f32 %v222_v38, %v148_v63  ;;  %v172_v2 = vsel %vm171_vm10, %v166_v58, %v170_v59 }
 0x114   :  { %174 = vst [vmem:[#allocation6] sm:$0xf] %v172_v2 }
 0x115   :  { %v175_v5 = vsub.f32 %v155_v3, %v149_v1  ;;  %v176_v6 = vsub.f32 %v158_v0, %v147_v4  ;;  %195 = dma.vmem_to_hbm [thread:$0]  %s191_s23, 64, %s193_s26, [#allocation5]  }
 0x117   :  { %v178_v8 = vadd.f32 %v176_v6, %v165_v55  ;;  %v177_v9 = vadd.f32 %v175_v5, %v165_v55 }
 0x119   :  { %v181_v10 = vrot.slane %v178_v8, 6 }
 0x11b   :  { %v182_v11 = vsel %vm171_vm10, %v177_v9, %v181_v10 }
 0x11c   :  { %184 = vst [vmem:[#allocation7] sm:$0xf] %v182_v11 }
 0x11d   :  { %206 = dma.vmem_to_hbm [thread:$0]  %s202_s2, 64, %s204_s29, [#allocation8]  }
 0x11e   :  { %306 = dma.done.wait [#allocation5], 64  }
 0x11f   :  { %307 = vsyncadd [#allocation5], 4294967232 }
 0x120   :  { %308 = dma.done.wait [#allocation8], 64  }
 0x121   :  { %309 = vsyncadd [#allocation8], 4294967232 }
 0x122   :  { %215 = vsyncpa [#allocation4], 1 }
 0x123   :  { %216 = vsyncpa [#allocation5], 1 }
 0x124   :  { %217 = vsyncpa [#allocation8], 1 }

</bundles_post_ra>
